<compile_context>
chip_gen: v5e
topology: v5e:2x2
jax: 0.10.0
libtpu: 0.0.40
codegen_flags: <defaults>
</compile_context>

<pallas_src>
import jax
import jax.numpy as jnp
from jax.experimental import pallas as pl
from jax.experimental.pallas import tpu as pltpu


def _round_up(x, m):
    return ((x + m - 1) // m) * m


def _maxpool_kernel(x_ref, o_ref):
    # x_ref: (block_b, C, P) ; o_ref: (block_b, C)
    # Max-reduce the trailing (num_points) axis; output is lane-dense in C.
    o_ref[...] = jnp.max(x_ref[...], axis=-1)


def _pick_block_b(batch, num_channels, num_points, itemsize, target_bytes=4 << 20):
    """Rows (view-batch elements) per grid step, sized against a conservative
    VMEM estimate (trailing axis padded to 128 lanes by the f32 (8,128) tiling)."""
    lanes = _round_up(num_points, 128)
    bytes_per_row = num_channels * lanes * itemsize
    blk = max(1, target_bytes // bytes_per_row)
    if blk >= batch:
        return batch
    # Keep the output block's second-minor dim a multiple of 8 (sublane tiling)
    # whenever the block does not cover the full batch.
    blk = max(8, (blk // 8) * 8)
    return min(blk, batch)


def maxpool(input_data, num_channels, num_points, block_b=None):
    """Pallas equivalent of MaxPool.forward (exact torch .view semantics)."""
    total = input_data.size
    assert total % (num_channels * num_points) == 0, (
        "input size must be divisible by num_channels * num_points")
    batch = total // (num_channels * num_points)
    x3 = input_data.reshape(batch, num_channels, num_points)
    itemsize = jnp.dtype(x3.dtype).itemsize

    if block_b is None:
        block_b = _pick_block_b(batch, num_channels, num_points, itemsize)
    grid = (pl.cdiv(batch, block_b),)

    # Explicit scoped-VMEM limit: double-buffered (lane-padded) input blocks +
    # output blocks + headroom, clamped to a range safe on v5e/v6e/v7x.
    in_block_bytes = block_b * num_channels * _round_up(num_points, 128) * itemsize
    out_block_bytes = block_b * _round_up(num_channels, 128) * itemsize
    vmem_limit = int(min(48 << 20,
                         max(16 << 20, 3 * in_block_bytes + 3 * out_block_bytes)))

    return pl.pallas_call(
        _maxpool_kernel,
        out_shape=jax.ShapeDtypeStruct((batch, num_channels), x3.dtype),
        grid=grid,
        in_specs=[pl.BlockSpec((block_b, num_channels, num_points),
                               lambda i: (i, 0, 0))],
        out_specs=pl.BlockSpec((block_b, num_channels), lambda i: (i, 0)),
        compiler_params=pltpu.CompilerParams(
            dimension_semantics=("parallel",),
            vmem_limit_bytes=vmem_limit,
        ),
    )(x3)


if __name__ == "__main__":
    key = jax.random.PRNGKey(0)
    k1, k2 = jax.random.split(key)

    fwd = jax.jit(maxpool, static_argnames=("num_channels", "num_points", "block_b"))

    # Case 1: small PointNet-style input (batch * num_points, num_channels).
    batch, num_channels, num_points = 4, 128, 16
    x = jax.random.normal(k1, (batch * num_points, num_channels), jnp.float32)
    out = fwd(x, num_channels=num_channels, num_points=num_points)
    jax.block_until_ready(out)

    ref = jnp.max(x.reshape(-1, num_channels, num_points), axis=-1)
    assert out.shape == (batch, num_channels), out.shape
    assert out.dtype == jnp.float32
    assert bool(jnp.array_equal(out, ref))
    assert bool(jnp.all(jnp.isfinite(out)))

    # Case 2: larger input that exercises multi-step grid tiling / pipelining.
    x2 = jax.random.normal(k2, (16 * 16, 1024), jnp.float32)   # view-batch = 16
    out2 = fwd(x2, num_channels=1024, num_points=16, block_b=8)  # grid = (2,)
    jax.block_until_ready(out2)

    ref2 = jnp.max(x2.reshape(-1, 1024, 16), axis=-1)
    assert out2.shape == (16, 1024), out2.shape
    assert bool(jnp.array_equal(out2, ref2))
    assert bool(jnp.all(jnp.isfinite(out2)))

    print("KERNEL_OK")
</pallas_src>

<mosaic_0001>
module attributes {stable_mosaic.version = 11 : i64} {
  func.func @_maxpool_kernel(%arg0: i32, %arg1: memref<4x128x16xf32, #tpu.memory_space<vmem>>, %arg2: memref<4x128xf32, #tpu.memory_space<vmem>>) attributes {dimension_semantics = [#tpu.dimension_semantics<parallel>], iteration_bounds = array<i64: 1>, scalar_prefetch = 0 : i64, scratch_operands = 0 : i64, tpu.core_type = #tpu.core_type<tc>, window_params = [{transform_indices = @transform_0, window_bounds = array<i64: 4, 128, 16>}, {transform_indices = @transform_1, window_bounds = array<i64: 4, 128>}]} {
    %c0 = arith.constant 0 : index
    %c0_0 = arith.constant 0 : index
    %c0_1 = arith.constant 0 : index
    %0 = vector.load %arg1[%c0, %c0_0, %c0_1] : memref<4x128x16xf32, #tpu.memory_space<vmem>>, vector<4x128x16xf32>
    %cst = arith.constant dense<0xFF800000> : vector<4x128xf32>
    %1 = vector.multi_reduction <maximumf>, %0, %cst [2] : vector<4x128x16xf32> to vector<4x128xf32>
    %c0_2 = arith.constant 0 : index
    %c0_3 = arith.constant 0 : index
    %2 = vector.load %arg2[%c0_2, %c0_3] : memref<4x128xf32, #tpu.memory_space<vmem>>, vector<4x128xf32>
    tpu.vector_store %arg2[%c0_2, %c0_3], %1 {strides = array<i32>} : memref<4x128xf32, #tpu.memory_space<vmem>>, vector<4x128xf32>,
    return
  }
  func.func @transform_0(%arg0: i32) -> (i32, i32, i32) {
    %c0_i32 = arith.constant 0 : i32
    %c0_i32_0 = arith.constant 0 : i32
    %c0_i32_1 = arith.constant 0 : i32
    return %arg0, %c0_i32, %c0_i32_0 : i32, i32, i32
  }
  func.func @transform_1(%arg0: i32) -> (i32, i32) {
    %c0_i32 = arith.constant 0 : i32
    %c0_i32_0 = arith.constant 0 : i32
    return %arg0, %c0_i32 : i32, i32
  }
}

</mosaic_0001>

<bundles_post_ra>
// kernel: maxpool.1
= control target key start
LH: loop header
LB: loop body
LE: loop exit
PB: predicated region body
PF: predicated region fallthrough
CT: control target
= control target key end

     0   :  { %vm73_vm0 = vcmask 130048   ;;  %s981_s0 = inlined_call_operand.vmem [shape: f32[4,128,16], index: 0, kind: input, shape index: {}]   ;;  %s982_s1 = inlined_call_operand.hbm [shape: f32[4,128], index: 1, kind: output, shape index: {}]  }
   0x1   :  { %v11_v0 = vld [vmem:[%s981_s0 + $0x10] sm:$0xff]  ;;  %v9_v1 = vld [vmem:[%s981_s0] sm:$0xff]  ;;  %v12_v6 = vld [vmem:[%s981_s0 + $0x18] sm:$0xff] }
   0x2   :  { %v13_v2 = vld [vmem:[%s981_s0 + $0x20] sm:$0xff]  ;;  %v80_v3 = vsel %vm73_vm0, %v11_v0, -inf  ;;  %v74_v4 = vsel %vm73_vm0, %v9_v1, -inf  ;;  %v10_v7 = vld [vmem:[%s981_s0 + $0x8] sm:$0xff] }
   0x3   :  { %v86_v5 = vsel %vm73_vm0, %v13_v2, -inf  ;;  %81 = vmax.xlane.f32.xlu1 %v80_v3  ;;  %75 = vmax.xlane.f32.xlu0 %v74_v4  ;;  %v14_v8 = vld [vmem:[%s981_s0 + $0x28] sm:$0xff] }
   0x4   :  { %87 = vmax.xlane.f32.xlu2 %v86_v5 }
   0x5   :  { %6 = vsyncpa [#allocation3], 0  ;;  %v83_v9 = vsel %vm73_vm0, %v12_v6, -inf  ;;  %v77_v10 = vsel %vm73_vm0, %v10_v7, -inf  ;;  %v89_v11 = vsel %vm73_vm0, %v14_v8, -inf  ;;  %v16_v12 = vld [vmem:[%s981_s0 + $0x38] sm:$0xff] }
   0x6   :  { %v15_v13 = vld [vmem:[%s981_s0 + $0x30] sm:$0xff]  ;;  %v17_v14 = vld [vmem:[%s981_s0 + $0x40] sm:$0xff]  ;;  %v95_v15 = vsel %vm73_vm0, %v16_v12, -inf  ;;  %v18_v19 = vld [vmem:[%s981_s0 + $0x48] sm:$0xff]  ;;  %vm335_vm1 = vcmask 130112   ;;  %vm339_vm2 = vcmask 195712  }
   0x7   :  { %v92_v16 = vsel %vm73_vm0, %v15_v13, -inf  ;;  %v98_v17 = vsel %vm73_vm0, %v17_v14, -inf  ;;  %v19_v18 = vld [vmem:[%s981_s0 + $0x50] sm:$0xff]  ;;  %v20_v20 = vld [vmem:[%s981_s0 + $0x58] sm:$0xff]  ;;  %v101_v22 = vsel %vm73_vm0, %v18_v19, -inf  ;;  %v22_v24 = vld [vmem:[%s981_s0 + $0x68] sm:$0xff] }
   0x8   :  { %v104_v21 = vsel %vm73_vm0, %v19_v18, -inf  ;;  %v107_v23 = vsel %vm73_vm0, %v20_v20, -inf  ;;  %v21_v25 = vld [vmem:[%s981_s0 + $0x60] sm:$0xff]  ;;  %v23_v26 = vld [vmem:[%s981_s0 + $0x70] sm:$0xff]  ;;  %v113_v27 = vsel %vm73_vm0, %v22_v24, -inf  ;;  %v24_v31 = vld [vmem:[%s981_s0 + $0x78] sm:$0xff] }
   0x9   :  { %v110_v28 = vsel %vm73_vm0, %v21_v25, -inf  ;;  %v116_v29 = vsel %vm73_vm0, %v23_v26, -inf  ;;  %v25_v30 = vld [vmem:[%s981_s0 + $0x80] sm:$0xff]  ;;  %v26_v32 = vld [vmem:[%s981_s0 + $0x88] sm:$0xff]  ;;  %v119_v34 = vsel %vm73_vm0, %v24_v31, -inf  ;;  %v28_v36 = vld [vmem:[%s981_s0 + $0x98] sm:$0xff]  ;;  %v330_v26 = vlaneseq }
   0xa   :  { %v122_v33 = vsel %vm73_vm0, %v25_v30, -inf  ;;  %v125_v35 = vsel %vm73_vm0, %v26_v32, -inf  ;;  %v27_v37 = vld [vmem:[%s981_s0 + $0x90] sm:$0xff]  ;;  %v29_v38 = vld [vmem:[%s981_s0 + $0xa0] sm:$0xff]  ;;  %v131_v39 = vsel %vm73_vm0, %v28_v36, -inf  ;;  %v30_v43 = vld [vmem:[%s981_s0 + $0xa8] sm:$0xff] }
   0xb   :  { %84 = vmax.xlane.f32.xlu1 %v83_v9  ;;  %78 = vmax.xlane.f32.xlu0 %v77_v10  ;;  %v128_v40 = vsel %vm73_vm0, %v27_v37, -inf  ;;  %v134_v41 = vsel %vm73_vm0, %v29_v38, -inf  ;;  %v31_v42 = vld [vmem:[%s981_s0 + $0xb0] sm:$0xff]  ;;  %v32_v44 = vld [vmem:[%s981_s0 + $0xb8] sm:$0xff]  ;;  %v137_v46 = vsel %vm73_vm0, %v30_v43, -inf  ;;  %v34_v48 = vld [vmem:[%s981_s0 + $0xc8] sm:$0xff] }
   0xc   :  { %90 = vmax.xlane.f32.xlu2 %v89_v11  ;;  %v140_v45 = vsel %vm73_vm0, %v31_v42, -inf  ;;  %v143_v47 = vsel %vm73_vm0, %v32_v44, -inf  ;;  %v33_v49 = vld [vmem:[%s981_s0 + $0xc0] sm:$0xff]  ;;  %v35_v50 = vld [vmem:[%s981_s0 + $0xd0] sm:$0xff]  ;;  %v149_v51 = vsel %vm73_vm0, %v34_v48, -inf  ;;  %v36_v55 = vld [vmem:[%s981_s0 + $0xd8] sm:$0xff] }
   0xd   :  { %v146_v52 = vsel %vm73_vm0, %v33_v49, -inf  ;;  %v152_v53 = vsel %vm73_vm0, %v35_v50, -inf  ;;  %v37_v54 = vld [vmem:[%s981_s0 + $0xe0] sm:$0xff]  ;;  %v38_v56 = vld [vmem:[%s981_s0 + $0xe8] sm:$0xff]  ;;  %v155_v58 = vsel %vm73_vm0, %v36_v55, -inf  ;;  %v40_v60 = vld [vmem:[%s981_s0 + $0xf8] sm:$0xff] }
   0xe   :  { %v158_v57 = vsel %vm73_vm0, %v37_v54, -inf  ;;  %v161_v59 = vsel %vm73_vm0, %v38_v56, -inf  ;;  %v39_v61 = vld [vmem:[%s981_s0 + $0xf0] sm:$0xff]  ;;  %v41_v62 = vld [vmem:[%s981_s0 + $0x100] sm:$0xff]  ;;  %v167_v63 = vsel %vm73_vm0, %v40_v60, -inf  ;;  %v42_v3 = vld [vmem:[%s981_s0 + $0x108] sm:$0xff] }
   0xf   :  { %v164_v0 = vsel %vm73_vm0, %v39_v61, -inf  ;;  %v170_v1 = vsel %vm73_vm0, %v41_v62, -inf  ;;  %v43_v2 = vld [vmem:[%s981_s0 + $0x110] sm:$0xff]  ;;  %v44_v4 = vld [vmem:[%s981_s0 + $0x118] sm:$0xff]  ;;  %v173_v6 = vsel %vm73_vm0, %v42_v3, -inf  ;;  %v46_v8 = vld [vmem:[%s981_s0 + $0x128] sm:$0xff] }
  0x10   :  { %v176_v5 = vsel %vm73_vm0, %v43_v2, -inf  ;;  %v179_v7 = vsel %vm73_vm0, %v44_v4, -inf  ;;  %v45_v9 = vld [vmem:[%s981_s0 + $0x120] sm:$0xff]  ;;  %v47_v10 = vld [vmem:[%s981_s0 + $0x130] sm:$0xff]  ;;  %v185_v11 = vsel %vm73_vm0, %v46_v8, -inf  ;;  %v52_v20 = vld [vmem:[%s981_s0 + $0x158] sm:$0xff] }
  0x11   :  { %v182_v12 = vsel %vm73_vm0, %v45_v9, -inf  ;;  %v188_v13 = vsel %vm73_vm0, %v47_v10, -inf  ;;  %v49_v14 = vld [vmem:[%s981_s0 + $0x140] sm:$0xff]  ;;  %v59_v31 = vld [vmem:[%s981_s0 + $0x190] sm:$0xff]  ;;  %v60_v42 = vld [vmem:[%s981_s0 + $0x198] sm:$0xff]  ;;  %vm343_vm3 = vcmask 261312  }
  0x12   :  { %v224_v36 = vsel %vm73_vm0, %v59_v31, -inf  ;;  %vm347_vm4 = vcmask 326912   ;;  %vm351_vm5 = vcmask 392512   ;;  %v63_v2 = vld [vmem:[%s981_s0 + $0x1b0] sm:$0xff]  ;;  %vm355_vm6 = vcmask 458112   ;;  %s501_s21 = sshll.u32 %s982_s1, 4  ;;  %s502_s21 = int_to_ptr.hbm [resolvable:$true] %s501_s21 }
  0x13   :  { %96 = vmax.xlane.f32.xlu1 %v95_v15  ;;  %93 = vmax.xlane.f32.xlu0 %v92_v16  ;;  %v48_v15 = vld [vmem:[%s981_s0 + $0x138] sm:$0xff]  ;;  %v50_v16 = vld [vmem:[%s981_s0 + $0x148] sm:$0xff]  ;;  %vm359_vm7 = vcmask 523712   ;;  %vm363_vm8 = vcmask 589312   ;;  %vm367_vm9 = vcmask 654912   ;;  %vm371_vm10 = vcmask 720512  }
  0x14   :  { %99 = vmax.xlane.f32.xlu2 %v98_v17  ;;  %v194_v17 = vsel %vm73_vm0, %v49_v14, -inf  ;;  %v191_v18 = vsel %vm73_vm0, %v48_v15, -inf  ;;  %v197_v19 = vsel %vm73_vm0, %v50_v16, -inf  ;;  %vm375_vm11 = vcmask 786112  }
  0x15   :  { %vm379_vm12 = vcmask 851712   ;;  %vm383_vm13 = vcmask 917312   ;;  %vm387_vm14 = vcmask 982912   ;;  %vm391_vm15 = vcmask 1048512  }
  0x1b   :  { %105 = vmax.xlane.f32.xlu1 %v104_v21  ;;  %102 = vmax.xlane.f32.xlu0 %v101_v22  ;;  %v51_v21 = vld [vmem:[%s981_s0 + $0x150] sm:$0xff]  ;;  %v53_v22 = vld [vmem:[%s981_s0 + $0x160] sm:$0xff] }
  0x1c   :  { %108 = vmax.xlane.f32.xlu2 %v107_v23  ;;  %v203_v23 = vsel %vm73_vm0, %v52_v20, -inf  ;;  %v200_v24 = vsel %vm73_vm0, %v51_v21, -inf  ;;  %v206_v25 = vsel %vm73_vm0, %v53_v22, -inf  ;;  %v66_v20 = vld [vmem:[%s981_s0 + $0x1c8] sm:$0xff] }
  0x23   :  { %114 = vmax.xlane.f32.xlu1 %v113_v27  ;;  %111 = vmax.xlane.f32.xlu0 %v110_v28  ;;  %v58_v27 = vld [vmem:[%s981_s0 + $0x188] sm:$0xff]  ;;  %v57_v28 = vld [vmem:[%s981_s0 + $0x180] sm:$0xff] }
  0x24   :  { %117 = vmax.xlane.f32.xlu2 %v116_v29 }
  0x2b   :  { %123 = vmax.xlane.f32.xlu1 %v122_v33  ;;  %120 = vmax.xlane.f32.xlu0 %v119_v34  ;;  %v221_v33 = vsel %vm73_vm0, %v58_v27, -inf  ;;  %v218_v34 = vsel %vm73_vm0, %v57_v28, -inf }
  0x2c   :  { %126 = vmax.xlane.f32.xlu2 %v125_v35  ;;  %v739_v35 = vand.u32 127, %v330_v26 }
  0x2e   :  { %v743_v37 = vadd.s32 4294967272, %v739_v35  ;;  %v746_v38 = vadd.s32 4294967288, %v739_v35  ;;  %v761_v43 = vadd.s32 4294967264, %v739_v35  ;;  %v779_v60 = vadd.s32 4294967240, %v739_v35 }
  0x2f   :  { %v782_v61 = vadd.s32 4294967248, %v739_v35  ;;  %v808_v16 = vadd.s32 4294967216, %v739_v35 }
  0x33   :  { %132 = vmax.xlane.f32.xlu1 %v131_v39  ;;  %129 = vmax.xlane.f32.xlu0 %v128_v40  ;;  %v749_v39 = vadd.s32 4294967280, %v739_v35  ;;  %v752_v40 = vadd.s32 4294967256, %v739_v35 }
  0x34   :  { %135 = vmax.xlane.f32.xlu2 %v134_v41  ;;  %v61_v41 = vld [vmem:[%s981_s0 + $0x1a0] sm:$0xff] }
  0x3b   :  { %141 = vmax.xlane.f32.xlu1 %v140_v45  ;;  %138 = vmax.xlane.f32.xlu0 %v137_v46  ;;  %v62_v46 = vld [vmem:[%s981_s0 + $0x1a8] sm:$0xff] }
  0x3c   :  { %144 = vmax.xlane.f32.xlu2 %v143_v47  ;;  %v233_v56 = vsel %vm73_vm0, %v62_v46, -inf }
  0x43   :  { %150 = vmax.xlane.f32.xlu1 %v149_v51  ;;  %147 = vmax.xlane.f32.xlu0 %v146_v52  ;;  %v230_v52 = vsel %vm73_vm0, %v61_v41, -inf  ;;  %v841_v41 = vadd.s32 4294967184, %v739_v35 }
  0x44   :  { %153 = vmax.xlane.f32.xlu2 %v152_v53  ;;  %v227_v53 = vsel %vm73_vm0, %v60_v42, -inf  ;;  %v69_v42 = vld [vmem:[%s981_s0 + $0x1e0] sm:$0xff] }
  0x4b   :  { %159 = vmax.xlane.f32.xlu1 %v158_v57  ;;  %156 = vmax.xlane.f32.xlu0 %v155_v58 }
  0x4c   :  { %162 = vmax.xlane.f32.xlu2 %v161_v59 }
  0x53   :  { %168 = vmax.xlane.f32.xlu1 %v167_v63  ;;  %165 = vmax.xlane.f32.xlu0 %v164_v0  ;;  %v786_v63 = vadd.s32 4294967232, %v739_v35 }
  0x54   :  { %171 = vmax.xlane.f32.xlu2 %v170_v1  ;;  %v64_v1 = vld [vmem:[%s981_s0 + $0x1b8] sm:$0xff] }
  0x55   :  { %v239_v10 = vsel %vm73_vm0, %v64_v1, -inf }
  0x5b   :  { %177 = vmax.xlane.f32.xlu1 %v176_v5  ;;  %174 = vmax.xlane.f32.xlu0 %v173_v6  ;;  %v65_v5 = vld [vmem:[%s981_s0 + $0x1c0] sm:$0xff] }
  0x5c   :  { %180 = vmax.xlane.f32.xlu2 %v179_v7 }
  0x63   :  { %186 = vmax.xlane.f32.xlu1 %v185_v11  ;;  %183 = vmax.xlane.f32.xlu0 %v182_v12  ;;  %v236_v11 = vsel %vm73_vm0, %v63_v2, -inf  ;;  %v71_v2 = vld [vmem:[%s981_s0 + $0x1f0] sm:$0xff] }
  0x64   :  { %189 = vmax.xlane.f32.xlu2 %v188_v13  ;;  %v242_v13 = vsel %vm73_vm0, %v65_v5, -inf }
  0x6b   :  { %195 = vmax.xlane.f32.xlu1 %v194_v17  ;;  %192 = vmax.xlane.f32.xlu0 %v191_v18  ;;  %v811_v17 = vadd.s32 4294967224, %v739_v35  ;;  %v814_v18 = vadd.s32 4294967208, %v739_v35 }
  0x6c   :  { %198 = vmax.xlane.f32.xlu2 %v197_v19  ;;  %v67_v19 = vld [vmem:[%s981_s0 + $0x1d0] sm:$0xff] }
  0x6d   :  { %v248_v28 = vsel %vm73_vm0, %v67_v19, -inf }
  0x73   :  { %204 = vmax.xlane.f32.xlu1 %v203_v23  ;;  %201 = vmax.xlane.f32.xlu0 %v200_v24  ;;  %v68_v23 = vld [vmem:[%s981_s0 + $0x1d8] sm:$0xff] }
  0x74   :  { %207 = vmax.xlane.f32.xlu2 %v206_v25  ;;  %v251_v31 = vsel %vm73_vm0, %v68_v23, -inf }
  0x76   :  { %v82_v29 = vpop.xlane.xlu1 %81  ;;  %v76_v30 = vpop.xlane.xlu0 %75 }
  0x77   :  { %v88_v32 = vpop.xlane.xlu2 %87  ;;  %v332_v47 = vperm.slane %v76_v30, %v739_v35  ;;  %v338_v51 = vperm.slane %v82_v29, %v749_v39  ;;  %v245_v29 = vsel %vm73_vm0, %v66_v20, -inf }
  0x78   :  { %v346_v57 = vperm.slane %v88_v32, %v761_v43 }
  0x7b   :  { %222 = vmax.xlane.f32.xlu1 %v221_v33  ;;  %219 = vmax.xlane.f32.xlu0 %v218_v34  ;;  %v835_v34 = vadd.s32 4294967192, %v739_v35 }
  0x7c   :  { %225 = vmax.xlane.f32.xlu2 %v224_v36  ;;  %v838_v36 = vadd.s32 4294967200, %v739_v35 }
  0x7e   :  { %v85_v44 = vpop.xlane.xlu1 %84  ;;  %v79_v45 = vpop.xlane.xlu0 %78 }
  0x7f   :  { %v342_v48 = vperm.slane %v85_v44, %v743_v37  ;;  %v334_v49 = vperm.slane %v79_v45, %v746_v38  ;;  %v91_v50 = vpop.xlane.xlu2 %90  ;;  %v54_v44 = vld [vmem:[%s981_s0 + $0x168] sm:$0xff] }
  0x80   :  { %v350_v55 = vperm.slane %v91_v50, %v752_v40 }
  0x81   :  { %v336_v54 = vsel %vm335_vm1, %v334_v49, %v332_v47  ;;  %v55_v47 = vld [vmem:[%s981_s0 + $0x170] sm:$0xff] }
  0x82   :  { %v340_v58 = vsel %vm339_vm2, %v338_v51, %v336_v54 }
  0x83   :  { %v344_v59 = vsel %vm343_vm3, %v342_v48, %v340_v58  ;;  %231 = vmax.xlane.f32.xlu1 %v230_v52  ;;  %228 = vmax.xlane.f32.xlu0 %v227_v53  ;;  %v254_v52 = vsel %vm73_vm0, %v69_v42, -inf  ;;  %v209_v53 = vsel %vm73_vm0, %v54_v44, -inf  ;;  %v862_v58 = vadd.s32 4294967176, %v739_v35 }
  0x84   :  { %v348_v62 = vsel %vm347_vm4, %v346_v57, %v344_v59  ;;  %234 = vmax.xlane.f32.xlu2 %v233_v56  ;;  %v56_v59 = vld [vmem:[%s981_s0 + $0x178] sm:$0xff] }
  0x85   :  { %v352_v0 = vsel %vm351_vm5, %v350_v55, %v348_v62  ;;  %v212_v55 = vsel %vm73_vm0, %v55_v47, -inf  ;;  %v70_v62 = vld [vmem:[%s981_s0 + $0x1e8] sm:$0xff] }
  0x86   :  { %v97_v3 = vpop.xlane.xlu1 %96  ;;  %v94_v4 = vpop.xlane.xlu0 %93 }
  0x87   :  { %v358_v6 = vperm.slane %v97_v3, %v779_v60  ;;  %v354_v7 = vperm.slane %v94_v4, %v782_v61  ;;  %v100_v8 = vpop.xlane.xlu2 %99 }
  0x88   :  { %v362_v9 = vperm.slane %v100_v8, %v786_v63  ;;  %v257_v8 = vsel %vm73_vm0, %v70_v62, -inf }
  0x89   :  { %v356_v12 = vsel %vm355_vm6, %v354_v7, %v352_v0  ;;  %v215_v7 = vsel %vm73_vm0, %v56_v59, -inf }
  0x8a   :  { %v360_v14 = vsel %vm359_vm7, %v358_v6, %v356_v12  ;;  %v72_v12 = vld [vmem:[%s981_s0 + $0x1f8] sm:$0xff]  ;;  %s537_s0 = smov [#allocation2]  }
  0x8b   :  { %v364_v15 = vsel %vm363_vm8, %v362_v9, %v360_v14  ;;  %240 = vmax.xlane.f32.xlu1 %v239_v10  ;;  %237 = vmax.xlane.f32.xlu0 %v236_v11  ;;  %v260_v10 = vsel %vm73_vm0, %v71_v2, -inf  ;;  %s499_s18 = sshll.u32 %s537_s0, 4  ;;  %s500_s18 = int_to_ptr.vmem [resolvable:$true] %s499_s18 }
  0x8c   :  { %243 = vmax.xlane.f32.xlu2 %v242_v13 }
  0x8e   :  { %v106_v21 = vpop.xlane.xlu1 %105  ;;  %v103_v22 = vpop.xlane.xlu0 %102 }
  0x8f   :  { %v370_v24 = vperm.slane %v106_v21, %v808_v16  ;;  %v366_v25 = vperm.slane %v103_v22, %v811_v17  ;;  %v109_v26 = vpop.xlane.xlu2 %108  ;;  %v263_v22 = vsel %vm73_vm0, %v72_v12, -inf  ;;  %vm486_vm0 = vcmask 1041409  }
  0x90   :  { %v374_v27 = vperm.slane %v109_v26, %v814_v18 }
  0x91   :  { %v368_v30 = vsel %vm367_vm9, %v366_v25, %v364_v15 }
  0x92   :  { %v372_v32 = vsel %vm371_vm10, %v370_v24, %v368_v30 }
  0x93   :  { %v376_v33 = vsel %vm375_vm11, %v374_v27, %v372_v32  ;;  %249 = vmax.xlane.f32.xlu1 %v248_v28  ;;  %246 = vmax.xlane.f32.xlu0 %v245_v29 }
  0x94   :  { %252 = vmax.xlane.f32.xlu2 %v251_v31 }
  0x96   :  { %v115_v45 = vpop.xlane.xlu1 %114  ;;  %v112_v46 = vpop.xlane.xlu0 %111 }
  0x97   :  { %v382_v48 = vperm.slane %v115_v45, %v835_v34  ;;  %v378_v49 = vperm.slane %v112_v46, %v838_v36  ;;  %v118_v50 = vpop.xlane.xlu2 %117 }
  0x98   :  { %v386_v51 = vperm.slane %v118_v50, %v841_v41 }
  0x99   :  { %v380_v54 = vsel %vm379_vm12, %v378_v49, %v376_v33 }
  0x9a   :  { %v384_v56 = vsel %vm383_vm13, %v382_v48, %v380_v54 }
  0x9b   :  { %v388_v57 = vsel %vm387_vm14, %v386_v51, %v384_v56  ;;  %255 = vmax.xlane.f32.xlu1 %v254_v52  ;;  %210 = vmax.xlane.f32.xlu0 %v209_v53 }
  0x9c   :  { %213 = vmax.xlane.f32.xlu2 %v212_v55 }
  0x9e   :  { %v124_v0 = vpop.xlane.xlu1 %123  ;;  %v121_v1 = vpop.xlane.xlu0 %120 }
  0x9f   :  { %v393_v3 = vperm.slane %v124_v0, %v739_v35  ;;  %v390_v4 = vperm.slane %v121_v1, %v862_v58  ;;  %v127_v5 = vpop.xlane.xlu2 %126 }
  0xa0   :  { %v394_v6 = vperm.slane %v127_v5, %v746_v38 }
  0xa1   :  { %v392_v9 = vsel %vm391_vm15, %v390_v4, %v388_v57 }
  0xa2   :  { %v395_v11 = vsel %vm335_vm1, %v394_v6, %v393_v3 }
  0xa3   :  { %216 = vmax.xlane.f32.xlu1 %v215_v7  ;;  %258 = vmax.xlane.f32.xlu0 %v257_v8 }
  0xa4   :  { %261 = vmax.xlane.f32.xlu2 %v260_v10 }
  0xa6   :  { %v133_v13 = vpop.xlane.xlu1 %132  ;;  %v130_v14 = vpop.xlane.xlu0 %129 }
  0xa7   :  { %v398_v15 = vperm.slane %v133_v13, %v743_v37  ;;  %v396_v19 = vperm.slane %v130_v14, %v749_v39  ;;  %v136_v20 = vpop.xlane.xlu2 %135 }
  0xa8   :  { %v400_v21 = vperm.slane %v136_v20, %v761_v43 }
  0xa9   :  { %v397_v23 = vsel %vm339_vm2, %v396_v19, %v395_v11 }
  0xaa   :  { %v399_v24 = vsel %vm343_vm3, %v398_v15, %v397_v23 }
  0xab   :  { %v401_v25 = vsel %vm347_vm4, %v400_v21, %v399_v24  ;;  %264 = vmax.xlane.f32.xlu0 %v263_v22 }
  0xae   :  { %v142_v26 = vpop.xlane.xlu1 %141  ;;  %v139_v27 = vpop.xlane.xlu0 %138 }
  0xaf   :  { %v404_v28 = vperm.slane %v142_v26, %v782_v61  ;;  %v402_v29 = vperm.slane %v139_v27, %v752_v40  ;;  %v145_v30 = vpop.xlane.xlu2 %144 }
  0xb0   :  { %v406_v31 = vperm.slane %v145_v30, %v779_v60 }
  0xb1   :  { %v403_v32 = vsel %vm351_vm5, %v402_v29, %v401_v25 }
  0xb2   :  { %v405_v33 = vsel %vm355_vm6, %v404_v28, %v403_v32 }
  0xb3   :  { %v407_v42 = vsel %vm359_vm7, %v406_v31, %v405_v33 }
  0xb6   :  { %v151_v44 = vpop.xlane.xlu1 %150  ;;  %v148_v45 = vpop.xlane.xlu0 %147 }
  0xb7   :  { %v410_v46 = vperm.slane %v151_v44, %v811_v17  ;;  %v408_v47 = vperm.slane %v148_v45, %v786_v63  ;;  %v154_v48 = vpop.xlane.xlu2 %153 }
  0xb8   :  { %v412_v49 = vperm.slane %v154_v48, %v808_v16 }
  0xb9   :  { %v409_v50 = vsel %vm363_vm8, %v408_v47, %v407_v42 }
  0xba   :  { %v411_v51 = vsel %vm367_vm9, %v410_v46, %v409_v50 }
  0xbb   :  { %v413_v52 = vsel %vm371_vm10, %v412_v49, %v411_v51 }
  0xbe   :  { %v160_v53 = vpop.xlane.xlu1 %159  ;;  %v157_v54 = vpop.xlane.xlu0 %156 }
  0xbf   :  { %v416_v55 = vperm.slane %v160_v53, %v838_v36  ;;  %v414_v56 = vperm.slane %v157_v54, %v814_v18  ;;  %v163_v57 = vpop.xlane.xlu2 %162 }
  0xc0   :  { %v418_v59 = vperm.slane %v163_v57, %v835_v34 }
  0xc1   :  { %v415_v62 = vsel %vm375_vm11, %v414_v56, %v413_v52 }
  0xc2   :  { %v417_v0 = vsel %vm379_vm12, %v416_v55, %v415_v62 }
  0xc3   :  { %v419_v1 = vsel %vm383_vm13, %v418_v59, %v417_v0 }
  0xc6   :  { %v169_v2 = vpop.xlane.xlu1 %168  ;;  %v166_v3 = vpop.xlane.xlu0 %165 }
  0xc7   :  { %v422_v4 = vperm.slane %v169_v2, %v862_v58  ;;  %v420_v5 = vperm.slane %v166_v3, %v841_v41  ;;  %v172_v6 = vpop.xlane.xlu2 %171 }
  0xc8   :  { %v424_v11 = vperm.slane %v172_v6, %v739_v35 }
  0xc9   :  { %v421_v7 = vsel %vm387_vm14, %v420_v5, %v419_v1 }
  0xca   :  { %v423_v8 = vsel %vm391_vm15, %v422_v4, %v421_v7 }
  0xcb   :  { %v913_v10 = vsel %vm486_vm0, %v423_v8, %v392_v9 }
  0xce   :  { %v178_v12 = vpop.xlane.xlu1 %177  ;;  %v175_v13 = vpop.xlane.xlu0 %174 }
  0xcf   :  { %v425_v14 = vperm.slane %v175_v13, %v746_v38  ;;  %v181_v15 = vpop.xlane.xlu2 %180  ;;  %v427_v42 = vperm.slane %v178_v12, %v749_v39 }
  0xd0   :  { %v429_v44 = vperm.slane %v181_v15, %v743_v37 }
  0xd1   :  { %v426_v19 = vsel %vm335_vm1, %v425_v14, %v424_v11 }
  0xd2   :  { %v428_v45 = vsel %vm339_vm2, %v427_v42, %v426_v19 }
  0xd3   :  { %v430_v49 = vsel %vm343_vm3, %v429_v44, %v428_v45 }
  0xd6   :  { %v187_v20 = vpop.xlane.xlu1 %186  ;;  %v184_v21 = vpop.xlane.xlu0 %183 }
  0xd7   :  { %v190_v22 = vpop.xlane.xlu2 %189  ;;  %v431_v46 = vperm.slane %v184_v21, %v761_v43  ;;  %v433_v50 = vperm.slane %v187_v20, %v752_v40 }
  0xd8   :  { %v435_v55 = vperm.slane %v190_v22, %v782_v61 }
  0xd9   :  { %v432_v54 = vsel %vm347_vm4, %v431_v46, %v430_v49 }
  0xda   :  { %v434_v57 = vsel %vm351_vm5, %v433_v50, %v432_v54 }
  0xdb   :  { %v436_v1 = vsel %vm355_vm6, %v435_v55, %v434_v57 }
  0xde   :  { %v196_v23 = vpop.xlane.xlu1 %195  ;;  %v193_v24 = vpop.xlane.xlu0 %192 }
  0xdf   :  { %v199_v25 = vpop.xlane.xlu2 %198  ;;  %v437_v59 = vperm.slane %v193_v24, %v779_v60 }
  0xe0   :  { %v441_v7 = vperm.slane %v199_v25, %v811_v17 }
  0xe6   :  { %v205_v26 = vpop.xlane.xlu1 %204  ;;  %v202_v27 = vpop.xlane.xlu0 %201 }
  0xe7   :  { %v208_v28 = vpop.xlane.xlu2 %207  ;;  %v443_v11 = vperm.slane %v202_v27, %v808_v16  ;;  %v445_v14 = vperm.slane %v205_v26, %v814_v18 }
  0xe8   :  { %v447_v24 = vperm.slane %v208_v28, %v838_v36 }
  0xee   :  { %v223_v9 = vpop.xlane.xlu1 %222  ;;  %v220_v29 = vpop.xlane.xlu0 %219 }
  0xef   :  { %v226_v30 = vpop.xlane.xlu2 %225  ;;  %v456_v51 = vperm.slane %v223_v9, %v746_v38  ;;  %v455_v52 = vperm.slane %v220_v29, %v739_v35  ;;  %v439_v38 = vperm.slane %v196_v23, %v786_v63 }
  0xf0   :  { %v458_v56 = vperm.slane %v226_v30, %v749_v39  ;;  %v438_v39 = vsel %vm359_vm7, %v437_v59, %v436_v1 }
  0xf1   :  { %v457_v62 = vsel %vm335_vm1, %v456_v51, %v455_v52  ;;  %vm488_vm1 = vcmask 1042434  }
  0xf2   :  { %v459_v35 = vsel %vm339_vm2, %v458_v56, %v457_v62  ;;  %vm490_vm2 = vcmask 1043459  }
  0xf6   :  { %v232_v31 = vpop.xlane.xlu1 %231  ;;  %v229_v32 = vpop.xlane.xlu0 %228 }
  0xf7   :  { %v235_v33 = vpop.xlane.xlu2 %234  ;;  %v460_v0 = vperm.slane %v229_v32, %v743_v37  ;;  %v462_v2 = vperm.slane %v232_v31, %v761_v43  ;;  %v440_v37 = vsel %vm363_vm8, %v439_v38, %v438_v39 }
  0xf8   :  { %v464_v8 = vperm.slane %v235_v33, %v752_v40  ;;  %v442_v43 = vsel %vm367_vm9, %v441_v7, %v440_v37 }
  0xf9   :  { %v461_v5 = vsel %vm343_vm3, %v460_v0, %v459_v35  ;;  %v444_v20 = vsel %vm371_vm10, %v443_v11, %v442_v43 }
  0xfa   :  { %v463_v12 = vsel %vm347_vm4, %v462_v2, %v461_v5 }
  0xfb   :  { %v465_v15 = vsel %vm351_vm5, %v464_v8, %v463_v12 }
  0xfe   :  { %v241_v47 = vpop.xlane.xlu1 %240  ;;  %v238_v48 = vpop.xlane.xlu0 %237 }
  0xff   :  { %v244_v53 = vpop.xlane.xlu2 %243  ;;  %v466_v13 = vperm.slane %v238_v48, %v782_v61  ;;  %v468_v19 = vperm.slane %v241_v47, %v779_v60  ;;  %v446_v61 = vsel %vm375_vm11, %v445_v14, %v444_v20 }
 0x100   :  { %v470_v25 = vperm.slane %v244_v53, %v786_v63  ;;  %v448_v60 = vsel %vm379_vm12, %v447_v24, %v446_v61 }
 0x101   :  { %v467_v40 = vsel %vm355_vm6, %v466_v13, %v465_v15 }
 0x102   :  { %v469_v27 = vsel %vm359_vm7, %v468_v19, %v467_v40 }
 0x103   :  { %v471_v29 = vsel %vm363_vm8, %v470_v25, %v469_v27 }
 0x106   :  { %v250_v3 = vpop.xlane.xlu1 %249  ;;  %v247_v4 = vpop.xlane.xlu0 %246 }
 0x107   :  { %v253_v6 = vpop.xlane.xlu2 %252  ;;  %v472_v26 = vperm.slane %v247_v4, %v811_v17  ;;  %v474_v30 = vperm.slane %v250_v3, %v808_v16 }
 0x108   :  { %v476_v42 = vperm.slane %v253_v6, %v814_v18 }
 0x109   :  { %v473_v28 = vsel %vm367_vm9, %v472_v26, %v471_v29 }
 0x10a   :  { %v475_v44 = vsel %vm371_vm10, %v474_v30, %v473_v28 }
 0x10b   :  { %v477_v50 = vsel %vm375_vm11, %v476_v42, %v475_v44 }
 0x10e   :  { %v256_v21 = vpop.xlane.xlu1 %255  ;;  %v211_v22 = vpop.xlane.xlu0 %210 }
 0x10f   :  { %v214_v23 = vpop.xlane.xlu2 %213  ;;  %v449_v9 = vperm.slane %v211_v22, %v835_v34  ;;  %v478_v45 = vperm.slane %v256_v21, %v838_v36 }
 0x110   :  { %v451_v31 = vperm.slane %v214_v23, %v841_v41 }
 0x111   :  { %v450_v63 = vsel %vm383_vm13, %v449_v9, %v448_v60  ;;  %v479_v18 = vsel %vm379_vm12, %v478_v45, %v477_v50 }
 0x112   :  { %v452_v46 = vsel %vm387_vm14, %v451_v31, %v450_v63 }
 0x116   :  { %v217_v32 = vpop.xlane.xlu1 %216  ;;  %v259_v33 = vpop.xlane.xlu0 %258 }
 0x117   :  { %v453_v17 = vperm.slane %v217_v32, %v862_v58  ;;  %v480_v47 = vperm.slane %v259_v33, %v835_v34  ;;  %v262_v48 = vpop.xlane.xlu2 %261 }
 0x118   :  { %v482_v51 = vperm.slane %v262_v48, %v841_v41 }
 0x119   :  { %v454_v16 = vsel %vm391_vm15, %v453_v17, %v452_v46  ;;  %v481_v52 = vsel %vm383_vm13, %v480_v47, %v479_v18 }
 0x11a   :  { %v489_v49 = vsel %vm488_vm1, %v454_v16, %v913_v10  ;;  %v483_v36 = vsel %vm387_vm14, %v482_v51, %v481_v52 }
 0x11e   :  { %v265_v53 = vpop.xlane.xlu0 %264 }
 0x11f   :  { %v484_v34 = vperm.slane %v265_v53, %v862_v58 }
 0x121   :  { %v485_v10 = vsel %vm391_vm15, %v484_v34, %v483_v36 }
 0x122   :  { %v491_v54 = vsel %vm490_vm2, %v485_v10, %v489_v49 }
 0x123   :  { %493 = vst [vmem:[#allocation2] sm:$0xf] %v491_v54 }
 0x124   :  { %504 = dma.vmem_to_hbm [thread:$0]  %s500_s18, 64, %s502_s21, [#allocation3]  }
 0x125   :  { %535 = dma.done.wait [#allocation3], 64  }
 0x126   :  { %536 = vsyncadd [#allocation3], 4294967232 }
 0x127   :  { %509 = vsyncpa [#allocation3], 1 }

</bundles_post_ra>
